<compile_context>
chip_gen: v7x
topology: tpu7x:2x2x1
jax: 0.10.0
libtpu: 0.0.40
codegen_flags: <defaults>
</compile_context>

<pallas_src>
import jax
import jax.numpy as jnp
from jax.experimental import pallas as pl
from jax.experimental.pallas import tpu as pltpu

LANE = 128      # lanes per vreg
SUBLANE = 8     # sublanes per vreg (f32)


def logreg_kernel(w_ref, b_ref, x_ref, o_ref):
    # w_ref: SMEM (2,)  b_ref: SMEM (1,)
    # x_ref: VMEM (2, TR, 128) feature-major batch tile
    # o_ref: VMEM (TR, 128)
    w0 = w_ref[0]
    w1 = w_ref[1]
    b = b_ref[0]
    # Pure VPU multiply-add (5 flops/element); batch is lane/sublane dense.
    z = x_ref[0] * w0 + x_ref[1] * w1 + b
    o_ref[...] = jax.nn.sigmoid(z).astype(o_ref.dtype)


def logistic_regression(x, weight, bias, *, block_rows=64):
    """x: (B, 2) f32, weight: (1, 2) f32 (PyTorch layout), bias: (1,) f32 -> (B, 1) f32."""
    B, F = x.shape
    assert F == 2 and weight.shape == (1, 2) and bias.shape == (1,)

    w = weight.reshape(2).astype(jnp.float32)
    b = bias.reshape(1).astype(jnp.float32)

    # Map batch onto a (rows, 128) grid of lanes; tile rows in multiples of 8.
    rows = pl.cdiv(B, LANE)
    tr = min(block_rows, ((rows + SUBLANE - 1) // SUBLANE) * SUBLANE)
    rows_pad = ((rows + tr - 1) // tr) * tr
    b_pad = rows_pad * LANE

    # (B, 2) -> (2, B) feature-major -> zero-pad -> (2, rows_pad, 128)
    x_t = jnp.pad(x.astype(jnp.float32).T, ((0, 0), (0, b_pad - B)))
    x_t = x_t.reshape(2, rows_pad, LANE)

    out = pl.pallas_call(
        logreg_kernel,
        out_shape=jax.ShapeDtypeStruct((rows_pad, LANE), jnp.float32),
        grid=(rows_pad // tr,),
        in_specs=[
            pl.BlockSpec(memory_space=pltpu.MemorySpace.SMEM),   # weight (2,)
            pl.BlockSpec(memory_space=pltpu.MemorySpace.SMEM),   # bias   (1,)
            pl.BlockSpec((2, tr, LANE), lambda i: (0, i, 0)),    # x tile
        ],
        out_specs=pl.BlockSpec((tr, LANE), lambda i: (i, 0)),
        compiler_params=pltpu.CompilerParams(
            dimension_semantics=("parallel",)),
    )(w, b, x_t)

    # Drop padding and restore the (B, 1) PyTorch output shape.
    return out.reshape(b_pad)[:B].reshape(B, 1)


if __name__ == "__main__":
    key = jax.random.PRNGKey(0)
    kx, kw, kb = jax.random.split(key, 3)

    batch = 8
    # nn.Linear(2, 1): weight (out=1, in=2), bias (1,)
    x = jax.random.normal(kx, (batch, 2), dtype=jnp.float32)
    weight = jax.random.normal(kw, (1, 2), dtype=jnp.float32) * 0.5
    bias = jax.random.normal(kb, (1,), dtype=jnp.float32) * 0.5

    out = logistic_regression(x, weight, bias)
    out = jax.block_until_ready(out)

    # Reference check in plain JAX (matches PyTorch forward semantics).
    ref = jax.nn.sigmoid(x @ weight.T + bias)
    assert out.shape == (batch, 1)
    assert jnp.allclose(out, ref, atol=1e-6), (out, ref)

    print("KERNEL_OK")
</pallas_src>

<mosaic_0001>
module attributes {stable_mosaic.version = 11 : i64} {
  func.func @logreg_kernel(%arg0: i32, %arg1: memref<2xf32, #tpu.memory_space<smem>>, %arg2: memref<1xf32, #tpu.memory_space<smem>>, %arg3: memref<2x8x128xf32, #tpu.memory_space<vmem>>, %arg4: memref<8x128xf32, #tpu.memory_space<vmem>>) attributes {dimension_semantics = [#tpu.dimension_semantics<parallel>], iteration_bounds = array<i64: 1>, scalar_prefetch = 0 : i64, scratch_operands = 0 : i64, tpu.core_type = #tpu.core_type<tc>, window_params = [{transform_indices = @transform_0, window_bounds = array<i64: 2>}, {transform_indices = @transform_1, window_bounds = array<i64: 1>}, {transform_indices = @transform_2, window_bounds = array<i64: 2, 8, 128>}, {transform_indices = @transform_3, window_bounds = array<i64: 8, 128>}]} {
    %c0 = arith.constant 0 : index
    %0 = memref.load %arg1[%c0] : memref<2xf32, #tpu.memory_space<smem>>
    %c1 = arith.constant 1 : index
    %1 = memref.load %arg1[%c1] : memref<2xf32, #tpu.memory_space<smem>>
    %c0_0 = arith.constant 0 : index
    %2 = memref.load %arg2[%c0_0] : memref<1xf32, #tpu.memory_space<smem>>
    %c0_1 = arith.constant 0 : index
    %c0_2 = arith.constant 0 : index
    %c0_3 = arith.constant 0 : index
    %3 = vector.load %arg3[%c0_1, %c0_2, %c0_3] : memref<2x8x128xf32, #tpu.memory_space<vmem>>, vector<1x8x128xf32>
    %4 = vector.shape_cast %3 : vector<1x8x128xf32> to vector<8x128xf32>
    %5 = vector.broadcast %0 : f32 to vector<8x128xf32>
    %6 = arith.mulf %4, %5 : vector<8x128xf32>
    %c1_4 = arith.constant 1 : index
    %c0_5 = arith.constant 0 : index
    %c0_6 = arith.constant 0 : index
    %7 = vector.load %arg3[%c1_4, %c0_5, %c0_6] : memref<2x8x128xf32, #tpu.memory_space<vmem>>, vector<1x8x128xf32>
    %8 = vector.shape_cast %7 : vector<1x8x128xf32> to vector<8x128xf32>
    %9 = vector.broadcast %1 : f32 to vector<8x128xf32>
    %10 = arith.mulf %8, %9 : vector<8x128xf32>
    %11 = arith.addf %6, %10 : vector<8x128xf32>
    %12 = vector.broadcast %2 : f32 to vector<8x128xf32>
    %13 = arith.addf %11, %12 : vector<8x128xf32>
    %14 = arith.negf %13 : vector<8x128xf32>
    %15 = math.exp %14 : vector<8x128xf32>
    %cst = arith.constant 1.000000e+00 : f32
    %16 = vector.broadcast %cst : f32 to vector<8x128xf32>
    %17 = arith.addf %16, %15 : vector<8x128xf32>
    %18 = arith.divf %16, %17 : vector<8x128xf32>
    %c0_7 = arith.constant 0 : index
    %c0_8 = arith.constant 0 : index
    %19 = vector.load %arg4[%c0_7, %c0_8] : memref<8x128xf32, #tpu.memory_space<vmem>>, vector<8x128xf32>
    tpu.vector_store %arg4[%c0_7, %c0_8], %18 {strides = array<i32>} : memref<8x128xf32, #tpu.memory_space<vmem>>, vector<8x128xf32>,
    return
  }
  func.func @transform_0(%arg0: i32) -> i32 {
    %c0_i32 = arith.constant 0 : i32
    %c0_i32_0 = arith.constant 0 : i32
    return %c0_i32 : i32
  }
  func.func @transform_1(%arg0: i32) -> i32 {
    %c0_i32 = arith.constant 0 : i32
    %c0_i32_0 = arith.constant 0 : i32
    return %c0_i32 : i32
  }
  func.func @transform_2(%arg0: i32) -> (i32, i32, i32) {
    %c0_i32 = arith.constant 0 : i32
    %c0_i32_0 = arith.constant 0 : i32
    %c0_i32_1 = arith.constant 0 : i32
    return %c0_i32, %arg0, %c0_i32_0 : i32, i32, i32
  }
  func.func @transform_3(%arg0: i32) -> (i32, i32) {
    %c0_i32 = arith.constant 0 : i32
    %c0_i32_0 = arith.constant 0 : i32
    return %arg0, %c0_i32 : i32, i32
  }
}

</mosaic_0001>

<bundles_post_ra>
// kernel: tpu_custom_call.1
= control target key start
LH: loop header
LB: loop body
LE: loop exit
PB: predicated region body
PF: predicated region fallthrough
CT: control target
= control target key end

     0   :  { %9 = vsyncpa [#allocation6], 0  ;;  %s207_s0 = inlined_call_operand.vmem [shape: f32[2], index: 0, kind: input, shape index: {}]   ;;  %s208_s1 = inlined_call_operand.<no memory space> [shape: f32[1], index: 1, kind: input, shape index: {}]   ;;  %s209_s2 = inlined_call_operand.hbm [shape: f32[2,8,128], index: 2, kind: input, shape index: {}]   ;;  %s210_s3 = inlined_call_operand.hbm [shape: f32[8,128], index: 3, kind: output, shape index: {}]  }
   0x1   :  { %10 = vsyncpa [#allocation4], 0 }
   0x2   :  { %11 = vsyncpa [#allocation5], 0  ;;  %s18_s14 = sshll.u32 %s207_s0, 4  ;;  %s19_s14 = int_to_ptr.vmem [resolvable:$true] %s18_s14 }
   0x3   :  { %s90_s15 = scalar_lea.vmem %s19_s14, 16  ;;  %p95_p1 = scmp.lt.s32.totalorder %s19_s14, %s19_s14 }
   0x4   :  { %p91_p0 = scmp.ne.s32.totalorder %s19_s14, %s90_s15  ;;  %p96_p2 = scmp.lt.s32.totalorder %s90_s15, %s90_s15 }
   0x6   :  { %p97_p3 = por %p96_p2, %p95_p1 }
   0x8   :  { %p98_p4 = pnand %p97_p3, %p91_p0 }
   0xa   :  { %101 = shalt.err (!%p98_p4)
}
   0xb   :  { %s152_s16 = smov [#allocation3]   ;;  %s153_s17 = smov [#allocation7]  }
   0xc   :  { %21 = dma.vmem_to_smem %s19_s14, 16, %s152_s16, [#allocation6]  }
   0xd   :  { %s29_s18 = sshll.u32 %s153_s17, 4  ;;  %s102_s21 = scalar_lea.hbm %s209_s2, 256  ;;  %s30_s18 = int_to_ptr.vmem [resolvable:$true] %s29_s18 }
   0xe   :  { %p103_p5 = scmp.ne.s32.totalorder %s209_s2, %s102_s21  ;;  %p106_p6 = scmp.lt.u32.totalorder %s102_s21, %s209_s2 }
  0x10   :  { %p108_p7 = pnand %p106_p6, %p103_p5 }
  0x12   :  { %111 = shalt.err (!%p108_p7)
}
  0x13   :  { %s112_s25 = scalar_lea.vmem %s30_s18, 256  ;;  %p117_p9 = scmp.lt.s32.totalorder %s30_s18, %s30_s18 }
  0x14   :  { %p113_p8 = scmp.ne.s32.totalorder %s30_s18, %s112_s25  ;;  %p118_p10 = scmp.lt.s32.totalorder %s112_s25, %s112_s25 }
  0x16   :  { %p119_p11 = por %p118_p10, %p117_p9 }
  0x18   :  { %p120_p12 = pnand %p119_p11, %p113_p8 }
  0x1a   :  { %123 = shalt.err (!%p120_p12)
}
  0x1b   :  { %s154_s26 = smov 128   ;;  %s155_s27 = smov 8  }
  0x1c   :  { %35 = dma.hbm_to_vmem [thread:$0]  %s209_s2, 256, %s30_s18, [#allocation4], %s154_s26, %s154_s26, %s155_s27  }
  0x1d   :  { %146 = dma.done.wait [#allocation6], 16  }
  0x1e   :  { %147 = vsyncadd [#allocation6], 4294967280 }
  0x1f   :  { %148 = dma.done.wait [#allocation4], 256  }
  0x20   :  { %149 = vsyncadd [#allocation4], 4294967040 }
  0x21   :  { %42 = sfence }
  0x22   :  { %s43_s30 = sld [smem:[#allocation3]]  ;;  %s79_s4 = sld [smem:[#allocation3 + $0x1]]  ;;  %v46_v0 = vld [vmem:[#allocation7] sm:$0xff]  ;;  %v50_v1 = vld [vmem:[#allocation7 + $0x8] sm:$0xff]  ;;  %v54_v6 = vstv %s208_s1 }
  0x23   :  { %s156_s2 = smov [#allocation8]  }
  0x24   :  { %s69_s7 = sshll.u32 %s156_s2, 4  ;;  %s70_s7 = int_to_ptr.vmem [resolvable:$true] %s69_s7 }
  0x25   :  { %s124_s8 = scalar_lea.vmem %s70_s7, 128  ;;  %p129_p0 = scmp.lt.s32.totalorder %s70_s7, %s70_s7 }
  0x26   :  { %p125_p13 = scmp.ne.s32.totalorder %s70_s7, %s124_s8  ;;  %p130_p1 = scmp.lt.s32.totalorder %s124_s8, %s124_s8 }
  0x28   :  { %v47_v2 = vstv %s43_s30  ;;  %v51_v3 = vstv %s79_s4  ;;  %p131_p2 = por %p130_p1, %p129_p0 }
  0x29   :  { %v48_v4 = vmul.f32 %v47_v2, %v46_v0  ;;  %v52_v5 = vmul.f32 %v51_v3, %v50_v1 }
  0x2a   :  { %p132_p3 = pnand %p131_p2, %p125_p13 }
  0x2b   :  { %v53_v7 = vadd.f32 %v52_v5, %v48_v4 }
  0x2d   :  { %v55_v8 = vadd.f32 %v54_v6, %v53_v7 }
  0x2f   :  { %v80_v9 = vmul.f32 -1.442695, %v55_v8 }
  0x31   :  { %86 = vpow2.f32 %v80_v9 }
  0x3b   :  { %v87_v10 = vpop.eup %86 }
  0x3c   :  { %v59_v11 = vadd.f32 1.0, %v87_v10 }
  0x3e   :  { %88 = vrcp.f32 %v59_v11 }
  0x48   :  { %v89_v12 = vpop.eup %88 }
  0x49   :  { %62 = vst [vmem:[#allocation8] sm:$0xff] %v89_v12 }
  0x4a   :  { %135 = shalt.err (!%p132_p3)
}
  0x4b   :  { %s136_s10 = scalar_lea.hbm %s210_s3, 128 }
  0x4c   :  { %p137_p4 = scmp.ne.s32.totalorder %s210_s3, %s136_s10  ;;  %p140_p5 = scmp.lt.u32.totalorder %s136_s10, %s210_s3 }
  0x4e   :  { %p142_p6 = pnand %p140_p5, %p137_p4 }
  0x50   :  { %145 = shalt.err (!%p142_p6)
}
  0x51   :  { %72 = dma.vmem_to_hbm [thread:$0]  %s70_s7, 128, %s210_s3, [#allocation5]  }
  0x52   :  { %150 = dma.done.wait [#allocation5], 128  }
  0x53   :  { %151 = vsyncadd [#allocation5], 4294967168 }
  0x54   :  { %76 = vsyncpa [#allocation4], 1 }
  0x55   :  { %77 = vsyncpa [#allocation5], 1 }
  0x56   :  { %78 = vsyncpa [#allocation6], 1 }

</bundles_post_ra>
